<compile_context>
chip_gen: v7x
topology: tpu7x:2x2x1
jax: 0.10.0
libtpu: 0.0.40
codegen_flags: <defaults>
</compile_context>

<pallas_src>
import functools

import jax
import jax.numpy as jnp
from jax.experimental import pallas as pl
from jax.experimental.pallas import tpu as pltpu

# Config values (typical SAC settings; the reference reads them from Config).
LOG_SIGN_MAX = 2.0
LOG_SIGN_MIN = -20.0
LN_EPS = 1e-5  # PyTorch nn.LayerNorm default eps


def _round_up(x, m):
    return (x + m - 1) // m * m


def _cdiv(a, b):
    return (a + b - 1) // b


def _tpu_generation():
    """Best-effort TPU generation detection for per-chip tiling defaults."""
    try:
        kind = jax.devices()[0].device_kind.lower()
    except Exception:
        return "unknown"
    if "v5 lite" in kind or "v5e" in kind or "v5lite" in kind:
        return "v5e"
    if "v6" in kind:
        return "v6e"
    if "7" in kind:
        return "v7x"
    return "other"


# ---------------------------------------------------------------------------
# Pallas kernel
# ---------------------------------------------------------------------------
def _actor_kernel(num_actions,
                  state_ref,   # (TB, num_inputs)  f32
                  w0_ref,      # (num_inputs, H)   bf16   trunk linear weight
                  wres_ref,    # (4, H, H)         bf16   [w1a, w1b, w2a, w2b]
                  vec_ref,     # (15, H)           f32    biases / gammas / betas
                  wh_ref,      # (H, OUT_PAD)      bf16   [wm | ws | 0-pad]
                  bh_ref,      # (1, OUT_PAD)      f32    [bm | bs | 0-pad]
                  out_ref):    # (TB, OUT_PAD)     f32    [mean | clamped log_std | junk]

    def linear(x, w, b):
        # bf16 MXU inputs, f32 accumulation; bias added in f32.
        return jnp.dot(x.astype(w.dtype), w,
                       preferred_element_type=jnp.float32) + b

    def layernorm(x, g, b):
        # Two-pass statistics (matches PyTorch; avoids E[x^2]-mu^2 cancellation).
        mu = jnp.mean(x, axis=-1, keepdims=True)
        d = x - mu
        var = jnp.mean(d * d, axis=-1, keepdims=True)
        return d * jax.lax.rsqrt(var + LN_EPS) * g + b

    def vec(i):
        # static slice -> (1, H) row of the packed vector slab
        return vec_ref[i:i + 1, :]

    x = state_ref[...].astype(jnp.float32)

    # trunk: Linear -> LayerNorm -> ReLU
    x = linear(x, w0_ref[...], vec(0))
    x = jnp.maximum(layernorm(x, vec(1), vec(2)), 0.0)

    # residual blocks: Linear -> LN -> ReLU -> Linear -> LN, relu(x + h)
    def residual_block(x, wi, vbase):
        h = linear(x, wres_ref[wi], vec(vbase + 0))
        h = jnp.maximum(layernorm(h, vec(vbase + 1), vec(vbase + 2)), 0.0)
        h = linear(h, wres_ref[wi + 1], vec(vbase + 3))
        h = layernorm(h, vec(vbase + 4), vec(vbase + 5))
        return jnp.maximum(x + h, 0.0)

    x = residual_block(x, 0, 3)   # block 1
    x = residual_block(x, 2, 9)   # block 2

    # fused heads: one MXU pass, lane-dense (TB, OUT_PAD) store
    head = linear(x, wh_ref[...], bh_ref[...])
    col = jax.lax.broadcasted_iota(jnp.int32, head.shape, 1)
    is_logstd = (col >= num_actions) & (col < 2 * num_actions)
    clamped = jnp.clip(head, LOG_SIGN_MIN, LOG_SIGN_MAX)
    out_ref[...] = jnp.where(is_logstd, clamped, head).astype(out_ref.dtype)


# ---------------------------------------------------------------------------
# One-time parameter packing (do this at init, NOT per forward call)
# ---------------------------------------------------------------------------
def pack_actor_params(params, weights_dtype=jnp.bfloat16):
    """Packs the 24 Actor params into 5 kernel slabs. Call once and cache."""
    (w0, b0, g0, be0,
     w1a, b1a, g1a, be1a, w1b, b1b, g1b, be1b,
     w2a, b2a, g2a, be2a, w2b, b2b, g2b, be2b,
     wm, bm, ws, bs) = params

    num_inputs, H = w0.shape
    A = wm.shape[1]
    assert wm.shape == (H, A) and ws.shape == (H, A)
    assert bm.shape == (1, A) and bs.shape == (1, A)

    out_pad = _round_up(max(2 * A, 128), 128)          # lane-dense head output

    w0p = w0.astype(weights_dtype)                                     # (in, H)
    wres = jnp.stack([w1a, w1b, w2a, w2b], axis=0).astype(weights_dtype)  # (4,H,H)
    vecs = jnp.concatenate(
        [b0, g0, be0,
         b1a, g1a, be1a, b1b, g1b, be1b,
         b2a, g2a, be2a, b2b, g2b, be2b], axis=0).astype(jnp.float32)  # (15,H)
    wh = jnp.pad(jnp.concatenate([wm, ws], axis=1),
                 ((0, 0), (0, out_pad - 2 * A))).astype(weights_dtype)  # (H,out_pad)
    bh = jnp.pad(jnp.concatenate([bm, bs], axis=1),
                 ((0, 0), (0, out_pad - 2 * A))).astype(jnp.float32)    # (1,out_pad)

    return dict(w0=w0p, wres=wres, vecs=vecs, wh=wh, bh=bh,
                num_inputs=num_inputs, hidden_dim=H,
                num_actions=A, out_pad=out_pad)


# ---------------------------------------------------------------------------
# Wrapper
# ---------------------------------------------------------------------------
def actor_forward(state, packed, *, batch_tile=None, interpret=False):
    """Runs the Actor forward pass in a single Pallas call.

    Args:
      state: (B, num_inputs) float32.
      packed: output of pack_actor_params (pre-packed slabs, made once).
      batch_tile: optional batch tile size override.

    Returns:
      (mean, log_std): each (B, num_actions) float32.
    """
    w0, wres, vecs, wh, bh = (packed["w0"], packed["wres"], packed["vecs"],
                              packed["wh"], packed["bh"])
    num_inputs = packed["num_inputs"]
    H = packed["hidden_dim"]
    A = packed["num_actions"]
    out_pad = packed["out_pad"]

    B, nin = state.shape
    assert nin == num_inputs

    gen = _tpu_generation()
    if batch_tile is None:
        # v5e MXU is 128-wide (M=128 native); v6e has 128 MiB VMEM so amortize
        # grid-step overhead with big tiles; v7x has only 64 MiB VMEM per TC.
        batch_tile = {"v5e": 128, "v6e": 512, "v7x": 256}.get(gen, 256)

    vmem_cap = (48 << 20) if gen == "v7x" else (96 << 20)
    slab_bytes = sum(int(a.size) * a.dtype.itemsize
                     for a in (w0, wres, vecs, wh, bh))

    def footprint(tb):
        io = 2 * tb * num_inputs * 4 + 2 * tb * out_pad * 4  # double-buffered tiles
        act = 6 * tb * H * 4                                  # live f32 activations
        return slab_bytes + io + act + (2 << 20)              # + slack

    # Even 8-aligned split of the batch: minimizes padded garbage rows
    # (e.g. B=300 -> two 152-row tiles instead of 256 + 44-used-of-256).
    num_tiles = max(1, _cdiv(B, batch_tile))
    if gen == "v7x" and B >= 16:
        # keep both TensorCores busy; make the grid even for core-parallel split
        num_tiles = max(2, num_tiles + (num_tiles % 2))
    tb = _round_up(_cdiv(B, num_tiles), 8)
    while tb > 8 and footprint(tb) > vmem_cap:
        tb = _round_up(tb // 2, 8)

    b_pad = _round_up(B, tb)
    if b_pad != B:
        state = jnp.pad(state, ((0, b_pad - B), (0, 0)))
    grid = (b_pad // tb,)

    vmem_limit = int(min(max(footprint(tb) + (4 << 20), 16 << 20), vmem_cap))

    # CORE_PARALLEL splits the batch grid across v7x's two TensorCores; only
    # use it when there is an even, multi-step grid to split.
    if gen == "v7x" and grid[0] >= 2 and grid[0] % 2 == 0:
        sem = pltpu.CORE_PARALLEL
    else:
        sem = pltpu.PARALLEL

    # Full-array VMEM residency for the weight slabs: copied in once, not
    # pipelined/double-buffered; only the state/out batch tiles are pipelined.
    vmem_full = pl.BlockSpec(memory_space=pltpu.MemorySpace.VMEM)

    flops = 2 * b_pad * (num_inputs * H + 4 * H * H + H * out_pad)
    bytes_accessed = int(state.size) * 4 + slab_bytes + b_pad * out_pad * 4
    cost = pl.CostEstimate(flops=flops,
                           transcendentals=5 * b_pad,   # one rsqrt per row per LN
                           bytes_accessed=bytes_accessed)

    out = pl.pallas_call(
        functools.partial(_actor_kernel, A),
        out_shape=jax.ShapeDtypeStruct((b_pad, out_pad), jnp.float32),
        grid=grid,
        in_specs=[pl.BlockSpec((tb, num_inputs), lambda i: (i, 0)),
                  vmem_full, vmem_full, vmem_full, vmem_full, vmem_full],
        out_specs=pl.BlockSpec((tb, out_pad), lambda i: (i, 0)),
        compiler_params=pltpu.CompilerParams(
            dimension_semantics=(sem,),
            vmem_limit_bytes=vmem_limit),
        cost_estimate=cost,
        interpret=interpret,
    )(state, w0, wres, vecs, wh, bh)

    mean = out[:B, :A]
    log_std = out[:B, A:2 * A]
    return mean, log_std


# ---------------------------------------------------------------------------
# Deterministic parameter initialization (mirrors weights_init: Xavier uniform
# for Linear weights with gain=1, zero biases; LayerNorm gamma=1, beta=0).
# ---------------------------------------------------------------------------
def _xavier_uniform(key, fan_in, fan_out):
    limit = jnp.sqrt(6.0 / (fan_in + fan_out))
    # stored (in, out) so the kernel computes x @ W directly
    return jax.random.uniform(
        key, (fan_in, fan_out), dtype=jnp.float32, minval=-limit, maxval=limit
    )


def init_actor_params(key, num_inputs, num_actions, hidden_dim):
    keys = jax.random.split(key, 7)

    def linear_params(k, fin, fout):
        return _xavier_uniform(k, fin, fout), jnp.zeros((1, fout), jnp.float32)

    def ln_params(dim):
        return jnp.ones((1, dim), jnp.float32), jnp.zeros((1, dim), jnp.float32)

    # trunk
    w0, b0 = linear_params(keys[0], num_inputs, hidden_dim)
    g0, be0 = ln_params(hidden_dim)
    # residual block 1
    w1a, b1a = linear_params(keys[1], hidden_dim, hidden_dim)
    g1a, be1a = ln_params(hidden_dim)
    w1b, b1b = linear_params(keys[2], hidden_dim, hidden_dim)
    g1b, be1b = ln_params(hidden_dim)
    # residual block 2
    w2a, b2a = linear_params(keys[3], hidden_dim, hidden_dim)
    g2a, be2a = ln_params(hidden_dim)
    w2b, b2b = linear_params(keys[4], hidden_dim, hidden_dim)
    g2b, be2b = ln_params(hidden_dim)
    # heads
    wm, bm = linear_params(keys[5], hidden_dim, num_actions)
    ws, bs = linear_params(keys[6], hidden_dim, num_actions)

    return (
        w0, b0, g0, be0,
        w1a, b1a, g1a, be1a, w1b, b1b, g1b, be1b,
        w2a, b2a, g2a, be2a, w2b, b2b, g2b, be2b,
        wm, bm, ws, bs,
    )


# ---------------------------------------------------------------------------
# Pure-JAX reference for correctness checking.
# weights_dtype=jnp.bfloat16 mirrors the kernel's matmul numerics exactly;
# weights_dtype=jnp.float32 is the original (PyTorch) full-precision path.
# ---------------------------------------------------------------------------
def actor_forward_ref(state, params, weights_dtype=jnp.float32):
    (w0, b0, g0, be0,
     w1a, b1a, g1a, be1a, w1b, b1b, g1b, be1b,
     w2a, b2a, g2a, be2a, w2b, b2b, g2b, be2b,
     wm, bm, ws, bs) = params

    def linear(x, w, b):
        return jnp.dot(x.astype(weights_dtype), w.astype(weights_dtype),
                       preferred_element_type=jnp.float32) + b

    def layernorm(x, g, b):
        mu = jnp.mean(x, axis=-1, keepdims=True)
        d = x - mu
        var = jnp.mean(d * d, axis=-1, keepdims=True)
        return d * jax.lax.rsqrt(var + LN_EPS) * g + b

    def rb(x, wa, ba, ga, bea, wb, bb, gb, beb):
        h = jnp.maximum(layernorm(linear(x, wa, ba), ga, bea), 0.0)
        h = layernorm(linear(h, wb, bb), gb, beb)
        return jnp.maximum(x + h, 0.0)

    x = jnp.maximum(layernorm(linear(state, w0, b0), g0, be0), 0.0)
    x = rb(x, w1a, b1a, g1a, be1a, w1b, b1b, g1b, be1b)
    x = rb(x, w2a, b2a, g2a, be2a, w2b, b2b, g2b, be2b)
    mean = linear(x, wm, bm)
    log_std = jnp.clip(linear(x, ws, bs), LOG_SIGN_MIN, LOG_SIGN_MAX)
    return mean, log_std


# TODO(synk): Actor.sample() (reparameterized Normal sampling + tanh squash +
# log-prob correction) is not implemented here; only forward() is kernelized.

if __name__ == "__main__":
    BATCH = 8
    NUM_INPUTS = 32
    NUM_ACTIONS = 8
    HIDDEN_DIM = 32

    key = jax.random.PRNGKey(0)
    k_state, k_params = jax.random.split(key)

    state = jax.random.normal(k_state, (BATCH, NUM_INPUTS), dtype=jnp.float32)
    params = init_actor_params(k_params, NUM_INPUTS, NUM_ACTIONS, HIDDEN_DIM)

    # Pack once (bf16 weight slabs); reuse on every forward call.
    packed = pack_actor_params(params)

    mean, log_std = actor_forward(state, packed)
    jax.block_until_ready((mean, log_std))

    assert mean.shape == (BATCH, NUM_ACTIONS)
    assert log_std.shape == (BATCH, NUM_ACTIONS)
    assert bool(jnp.all(jnp.isfinite(mean)))
    assert bool(jnp.all(jnp.isfinite(log_std)))

    # Reference with the kernel's bf16 matmul numerics -> tight tolerance.
    mean_bf, log_std_bf = actor_forward_ref(state, params,
                                            weights_dtype=jnp.bfloat16)
    assert jnp.allclose(mean, mean_bf, atol=2e-3, rtol=2e-3)
    assert jnp.allclose(log_std, log_std_bf, atol=2e-3, rtol=2e-3)

    # Full-f32 reference (original module semantics) -> bf16-level tolerance.
    mean_f32, log_std_f32 = actor_forward_ref(state, params,
                                              weights_dtype=jnp.float32)
    assert jnp.allclose(mean, mean_f32, atol=5e-2, rtol=5e-2)
    assert jnp.allclose(log_std, log_std_f32, atol=5e-2, rtol=5e-2)

    print("KERNEL_OK")
</pallas_src>

<mosaic_0001>
module attributes {stable_mosaic.version = 11 : i64} {
  func.func @_actor_kernel(%arg0: i32, %arg1: memref<8x32xf32, #tpu.memory_space<vmem>>, %arg2: memref<32x32xbf16, #tpu.memory_space<vmem>>, %arg3: memref<4x32x32xbf16, #tpu.memory_space<vmem>>, %arg4: memref<15x32xf32, #tpu.memory_space<vmem>>, %arg5: memref<32x128xbf16, #tpu.memory_space<vmem>>, %arg6: memref<1x128xf32, #tpu.memory_space<vmem>>, %arg7: memref<8x128xf32, #tpu.memory_space<vmem>>) attributes {dimension_semantics = [#tpu.dimension_semantics<parallel>], iteration_bounds = array<i64: 1>, scalar_prefetch = 0 : i64, scratch_operands = 0 : i64, tpu.core_type = #tpu.core_type<tc>, window_params = [{transform_indices = @transform_0, window_bounds = array<i64: 8, 32>}, {pipeline_mode = #tpu.pipeline_mode<synchronous>, transform_indices = @transform_1, window_bounds = array<i64: 32, 32>}, {pipeline_mode = #tpu.pipeline_mode<synchronous>, transform_indices = @transform_2, window_bounds = array<i64: 4, 32, 32>}, {pipeline_mode = #tpu.pipeline_mode<synchronous>, transform_indices = @transform_3, window_bounds = array<i64: 15, 32>}, {pipeline_mode = #tpu.pipeline_mode<synchronous>, transform_indices = @transform_4, window_bounds = array<i64: 32, 128>}, {pipeline_mode = #tpu.pipeline_mode<synchronous>, transform_indices = @transform_5, window_bounds = array<i64: 1, 128>}, {transform_indices = @transform_6, window_bounds = array<i64: 8, 128>}]} {
    %c0 = arith.constant 0 : index
    %c0_0 = arith.constant 0 : index
    %0 = vector.load %arg1[%c0, %c0_0] : memref<8x32xf32, #tpu.memory_space<vmem>>, vector<8x32xf32>
    %c0_1 = arith.constant 0 : index
    %c0_2 = arith.constant 0 : index
    %1 = vector.load %arg2[%c0_1, %c0_2] : memref<32x32xbf16, #tpu.memory_space<vmem>>, vector<32x32xbf16>
    %c0_3 = arith.constant 0 : index
    %c0_4 = arith.constant 0 : index
    %2 = vector.load %arg4[%c0_3, %c0_4] : memref<15x32xf32, #tpu.memory_space<vmem>>, vector<1x32xf32>
    %3 = arith.truncf %0 : vector<8x32xf32> to vector<8x32xbf16>
    %cst = arith.constant dense<0.000000e+00> : vector<8x32xf32>
    %4 = tpu.matmul %3, %1, %cst {dimension_numbers = #tpu.dot_dimension_numbers<[1], [0], [0], [1], [0, 0, 1, 1], [], []>} : vector<8x32xbf16>, vector<32x32xbf16>, vector<8x32xf32> -> vector<8x32xf32>
    %5 = vector.broadcast %2 : vector<1x32xf32> to vector<8x32xf32>
    %6 = arith.addf %4, %5 : vector<8x32xf32>
    %c1 = arith.constant 1 : index
    %c0_5 = arith.constant 0 : index
    %7 = vector.load %arg4[%c1, %c0_5] : memref<15x32xf32, #tpu.memory_space<vmem>>, vector<1x32xf32>
    %c2 = arith.constant 2 : index
    %c0_6 = arith.constant 0 : index
    %8 = vector.load %arg4[%c2, %c0_6] : memref<15x32xf32, #tpu.memory_space<vmem>>, vector<1x32xf32>
    %cst_7 = arith.constant dense<0.000000e+00> : vector<8xf32>
    %9 = vector.multi_reduction <add>, %6, %cst_7 [1] : vector<8x32xf32> to vector<8xf32>
    %10 = vector.shape_cast %9 : vector<8xf32> to vector<8x1xf32>
    %cst_8 = arith.constant 3.200000e+01 : f32
    %11 = vector.broadcast %cst_8 : f32 to vector<8x1xf32>
    %12 = arith.divf %10, %11 : vector<8x1xf32>
    %13 = vector.broadcast %12 : vector<8x1xf32> to vector<8x32xf32>
    %14 = arith.subf %6, %13 : vector<8x32xf32>
    %15 = arith.mulf %14, %14 : vector<8x32xf32>
    %cst_9 = arith.constant dense<0.000000e+00> : vector<8xf32>
    %16 = vector.multi_reduction <add>, %15, %cst_9 [1] : vector<8x32xf32> to vector<8xf32>
    %17 = vector.shape_cast %16 : vector<8xf32> to vector<8x1xf32>
    %cst_10 = arith.constant 3.200000e+01 : f32
    %18 = vector.broadcast %cst_10 : f32 to vector<8x1xf32>
    %19 = arith.divf %17, %18 : vector<8x1xf32>
    %cst_11 = arith.constant 9.99999974E-6 : f32
    %20 = vector.broadcast %cst_11 : f32 to vector<8x1xf32>
    %21 = arith.addf %19, %20 : vector<8x1xf32>
    %22 = math.rsqrt %21 : vector<8x1xf32>
    %23 = vector.broadcast %22 : vector<8x1xf32> to vector<8x32xf32>
    %24 = arith.mulf %14, %23 : vector<8x32xf32>
    %25 = vector.broadcast %7 : vector<1x32xf32> to vector<8x32xf32>
    %26 = arith.mulf %24, %25 : vector<8x32xf32>
    %27 = vector.broadcast %8 : vector<1x32xf32> to vector<8x32xf32>
    %28 = arith.addf %26, %27 : vector<8x32xf32>
    %cst_12 = arith.constant 0.000000e+00 : f32
    %29 = vector.broadcast %cst_12 : f32 to vector<8x32xf32>
    %30 = arith.maximumf %28, %29 : vector<8x32xf32>
    %c0_13 = arith.constant 0 : index
    %c0_14 = arith.constant 0 : index
    %c0_15 = arith.constant 0 : index
    %31 = vector.load %arg3[%c0_13, %c0_14, %c0_15] : memref<4x32x32xbf16, #tpu.memory_space<vmem>>, vector<1x32x32xbf16>
    %32 = vector.shape_cast %31 : vector<1x32x32xbf16> to vector<32x32xbf16>
    %c3 = arith.constant 3 : index
    %c0_16 = arith.constant 0 : index
    %33 = vector.load %arg4[%c3, %c0_16] : memref<15x32xf32, #tpu.memory_space<vmem>>, vector<1x32xf32>
    %34 = arith.truncf %30 : vector<8x32xf32> to vector<8x32xbf16>
    %cst_17 = arith.constant dense<0.000000e+00> : vector<8x32xf32>
    %35 = tpu.matmul %34, %32, %cst_17 {dimension_numbers = #tpu.dot_dimension_numbers<[1], [0], [0], [1], [0, 0, 1, 1], [], []>} : vector<8x32xbf16>, vector<32x32xbf16>, vector<8x32xf32> -> vector<8x32xf32>
    %36 = vector.broadcast %33 : vector<1x32xf32> to vector<8x32xf32>
    %37 = arith.addf %35, %36 : vector<8x32xf32>
    %c4 = arith.constant 4 : index
    %c0_18 = arith.constant 0 : index
    %38 = vector.load %arg4[%c4, %c0_18] : memref<15x32xf32, #tpu.memory_space<vmem>>, vector<1x32xf32>
    %c5 = arith.constant 5 : index
    %c0_19 = arith.constant 0 : index
    %39 = vector.load %arg4[%c5, %c0_19] : memref<15x32xf32, #tpu.memory_space<vmem>>, vector<1x32xf32>
    %cst_20 = arith.constant dense<0.000000e+00> : vector<8xf32>
    %40 = vector.multi_reduction <add>, %37, %cst_20 [1] : vector<8x32xf32> to vector<8xf32>
    %41 = vector.shape_cast %40 : vector<8xf32> to vector<8x1xf32>
    %cst_21 = arith.constant 3.200000e+01 : f32
    %42 = vector.broadcast %cst_21 : f32 to vector<8x1xf32>
    %43 = arith.divf %41, %42 : vector<8x1xf32>
    %44 = vector.broadcast %43 : vector<8x1xf32> to vector<8x32xf32>
    %45 = arith.subf %37, %44 : vector<8x32xf32>
    %46 = arith.mulf %45, %45 : vector<8x32xf32>
    %cst_22 = arith.constant dense<0.000000e+00> : vector<8xf32>
    %47 = vector.multi_reduction <add>, %46, %cst_22 [1] : vector<8x32xf32> to vector<8xf32>
    %48 = vector.shape_cast %47 : vector<8xf32> to vector<8x1xf32>
    %cst_23 = arith.constant 3.200000e+01 : f32
    %49 = vector.broadcast %cst_23 : f32 to vector<8x1xf32>
    %50 = arith.divf %48, %49 : vector<8x1xf32>
    %cst_24 = arith.constant 9.99999974E-6 : f32
    %51 = vector.broadcast %cst_24 : f32 to vector<8x1xf32>
    %52 = arith.addf %50, %51 : vector<8x1xf32>
    %53 = math.rsqrt %52 : vector<8x1xf32>
    %54 = vector.broadcast %53 : vector<8x1xf32> to vector<8x32xf32>
    %55 = arith.mulf %45, %54 : vector<8x32xf32>
    %56 = vector.broadcast %38 : vector<1x32xf32> to vector<8x32xf32>
    %57 = arith.mulf %55, %56 : vector<8x32xf32>
    %58 = vector.broadcast %39 : vector<1x32xf32> to vector<8x32xf32>
    %59 = arith.addf %57, %58 : vector<8x32xf32>
    %cst_25 = arith.constant 0.000000e+00 : f32
    %60 = vector.broadcast %cst_25 : f32 to vector<8x32xf32>
    %61 = arith.maximumf %59, %60 : vector<8x32xf32>
    %c1_26 = arith.constant 1 : index
    %c0_27 = arith.constant 0 : index
    %c0_28 = arith.constant 0 : index
    %62 = vector.load %arg3[%c1_26, %c0_27, %c0_28] : memref<4x32x32xbf16, #tpu.memory_space<vmem>>, vector<1x32x32xbf16>
    %63 = vector.shape_cast %62 : vector<1x32x32xbf16> to vector<32x32xbf16>
    %c6 = arith.constant 6 : index
    %c0_29 = arith.constant 0 : index
    %64 = vector.load %arg4[%c6, %c0_29] : memref<15x32xf32, #tpu.memory_space<vmem>>, vector<1x32xf32>
    %65 = arith.truncf %61 : vector<8x32xf32> to vector<8x32xbf16>
    %cst_30 = arith.constant dense<0.000000e+00> : vector<8x32xf32>
    %66 = tpu.matmul %65, %63, %cst_30 {dimension_numbers = #tpu.dot_dimension_numbers<[1], [0], [0], [1], [0, 0, 1, 1], [], []>} : vector<8x32xbf16>, vector<32x32xbf16>, vector<8x32xf32> -> vector<8x32xf32>
    %67 = vector.broadcast %64 : vector<1x32xf32> to vector<8x32xf32>
    %68 = arith.addf %66, %67 : vector<8x32xf32>
    %c7 = arith.constant 7 : index
    %c0_31 = arith.constant 0 : index
    %69 = vector.load %arg4[%c7, %c0_31] : memref<15x32xf32, #tpu.memory_space<vmem>>, vector<1x32xf32>
    %c8 = arith.constant 8 : index
    %c0_32 = arith.constant 0 : index
    %70 = vector.load %arg4[%c8, %c0_32] : memref<15x32xf32, #tpu.memory_space<vmem>>, vector<1x32xf32>
    %cst_33 = arith.constant dense<0.000000e+00> : vector<8xf32>
    %71 = vector.multi_reduction <add>, %68, %cst_33 [1] : vector<8x32xf32> to vector<8xf32>
    %72 = vector.shape_cast %71 : vector<8xf32> to vector<8x1xf32>
    %cst_34 = arith.constant 3.200000e+01 : f32
    %73 = vector.broadcast %cst_34 : f32 to vector<8x1xf32>
    %74 = arith.divf %72, %73 : vector<8x1xf32>
    %75 = vector.broadcast %74 : vector<8x1xf32> to vector<8x32xf32>
    %76 = arith.subf %68, %75 : vector<8x32xf32>
    %77 = arith.mulf %76, %76 : vector<8x32xf32>
    %cst_35 = arith.constant dense<0.000000e+00> : vector<8xf32>
    %78 = vector.multi_reduction <add>, %77, %cst_35 [1] : vector<8x32xf32> to vector<8xf32>
    %79 = vector.shape_cast %78 : vector<8xf32> to vector<8x1xf32>
    %cst_36 = arith.constant 3.200000e+01 : f32
    %80 = vector.broadcast %cst_36 : f32 to vector<8x1xf32>
    %81 = arith.divf %79, %80 : vector<8x1xf32>
    %cst_37 = arith.constant 9.99999974E-6 : f32
    %82 = vector.broadcast %cst_37 : f32 to vector<8x1xf32>
    %83 = arith.addf %81, %82 : vector<8x1xf32>
    %84 = math.rsqrt %83 : vector<8x1xf32>
    %85 = vector.broadcast %84 : vector<8x1xf32> to vector<8x32xf32>
    %86 = arith.mulf %76, %85 : vector<8x32xf32>
    %87 = vector.broadcast %69 : vector<1x32xf32> to vector<8x32xf32>
    %88 = arith.mulf %86, %87 : vector<8x32xf32>
    %89 = vector.broadcast %70 : vector<1x32xf32> to vector<8x32xf32>
    %90 = arith.addf %88, %89 : vector<8x32xf32>
    %91 = arith.addf %30, %90 : vector<8x32xf32>
    %cst_38 = arith.constant 0.000000e+00 : f32
    %92 = vector.broadcast %cst_38 : f32 to vector<8x32xf32>
    %93 = arith.maximumf %91, %92 : vector<8x32xf32>
    %c2_39 = arith.constant 2 : index
    %c0_40 = arith.constant 0 : index
    %c0_41 = arith.constant 0 : index
    %94 = vector.load %arg3[%c2_39, %c0_40, %c0_41] : memref<4x32x32xbf16, #tpu.memory_space<vmem>>, vector<1x32x32xbf16>
    %95 = vector.shape_cast %94 : vector<1x32x32xbf16> to vector<32x32xbf16>
    %c9 = arith.constant 9 : index
    %c0_42 = arith.constant 0 : index
    %96 = vector.load %arg4[%c9, %c0_42] : memref<15x32xf32, #tpu.memory_space<vmem>>, vector<1x32xf32>
    %97 = arith.truncf %93 : vector<8x32xf32> to vector<8x32xbf16>
    %cst_43 = arith.constant dense<0.000000e+00> : vector<8x32xf32>
    %98 = tpu.matmul %97, %95, %cst_43 {dimension_numbers = #tpu.dot_dimension_numbers<[1], [0], [0], [1], [0, 0, 1, 1], [], []>} : vector<8x32xbf16>, vector<32x32xbf16>, vector<8x32xf32> -> vector<8x32xf32>
    %99 = vector.broadcast %96 : vector<1x32xf32> to vector<8x32xf32>
    %100 = arith.addf %98, %99 : vector<8x32xf32>
    %c10 = arith.constant 10 : index
    %c0_44 = arith.constant 0 : index
    %101 = vector.load %arg4[%c10, %c0_44] : memref<15x32xf32, #tpu.memory_space<vmem>>, vector<1x32xf32>
    %c11 = arith.constant 11 : index
    %c0_45 = arith.constant 0 : index
    %102 = vector.load %arg4[%c11, %c0_45] : memref<15x32xf32, #tpu.memory_space<vmem>>, vector<1x32xf32>
    %cst_46 = arith.constant dense<0.000000e+00> : vector<8xf32>
    %103 = vector.multi_reduction <add>, %100, %cst_46 [1] : vector<8x32xf32> to vector<8xf32>
    %104 = vector.shape_cast %103 : vector<8xf32> to vector<8x1xf32>
    %cst_47 = arith.constant 3.200000e+01 : f32
    %105 = vector.broadcast %cst_47 : f32 to vector<8x1xf32>
    %106 = arith.divf %104, %105 : vector<8x1xf32>
    %107 = vector.broadcast %106 : vector<8x1xf32> to vector<8x32xf32>
    %108 = arith.subf %100, %107 : vector<8x32xf32>
    %109 = arith.mulf %108, %108 : vector<8x32xf32>
    %cst_48 = arith.constant dense<0.000000e+00> : vector<8xf32>
    %110 = vector.multi_reduction <add>, %109, %cst_48 [1] : vector<8x32xf32> to vector<8xf32>
    %111 = vector.shape_cast %110 : vector<8xf32> to vector<8x1xf32>
    %cst_49 = arith.constant 3.200000e+01 : f32
    %112 = vector.broadcast %cst_49 : f32 to vector<8x1xf32>
    %113 = arith.divf %111, %112 : vector<8x1xf32>
    %cst_50 = arith.constant 9.99999974E-6 : f32
    %114 = vector.broadcast %cst_50 : f32 to vector<8x1xf32>
    %115 = arith.addf %113, %114 : vector<8x1xf32>
    %116 = math.rsqrt %115 : vector<8x1xf32>
    %117 = vector.broadcast %116 : vector<8x1xf32> to vector<8x32xf32>
    %118 = arith.mulf %108, %117 : vector<8x32xf32>
    %119 = vector.broadcast %101 : vector<1x32xf32> to vector<8x32xf32>
    %120 = arith.mulf %118, %119 : vector<8x32xf32>
    %121 = vector.broadcast %102 : vector<1x32xf32> to vector<8x32xf32>
    %122 = arith.addf %120, %121 : vector<8x32xf32>
    %cst_51 = arith.constant 0.000000e+00 : f32
    %123 = vector.broadcast %cst_51 : f32 to vector<8x32xf32>
    %124 = arith.maximumf %122, %123 : vector<8x32xf32>
    %c3_52 = arith.constant 3 : index
    %c0_53 = arith.constant 0 : index
    %c0_54 = arith.constant 0 : index
    %125 = vector.load %arg3[%c3_52, %c0_53, %c0_54] : memref<4x32x32xbf16, #tpu.memory_space<vmem>>, vector<1x32x32xbf16>
    %126 = vector.shape_cast %125 : vector<1x32x32xbf16> to vector<32x32xbf16>
    %c12 = arith.constant 12 : index
    %c0_55 = arith.constant 0 : index
    %127 = vector.load %arg4[%c12, %c0_55] : memref<15x32xf32, #tpu.memory_space<vmem>>, vector<1x32xf32>
    %128 = arith.truncf %124 : vector<8x32xf32> to vector<8x32xbf16>
    %cst_56 = arith.constant dense<0.000000e+00> : vector<8x32xf32>
    %129 = tpu.matmul %128, %126, %cst_56 {dimension_numbers = #tpu.dot_dimension_numbers<[1], [0], [0], [1], [0, 0, 1, 1], [], []>} : vector<8x32xbf16>, vector<32x32xbf16>, vector<8x32xf32> -> vector<8x32xf32>
    %130 = vector.broadcast %127 : vector<1x32xf32> to vector<8x32xf32>
    %131 = arith.addf %129, %130 : vector<8x32xf32>
    %c13 = arith.constant 13 : index
    %c0_57 = arith.constant 0 : index
    %132 = vector.load %arg4[%c13, %c0_57] : memref<15x32xf32, #tpu.memory_space<vmem>>, vector<1x32xf32>
    %c14 = arith.constant 14 : index
    %c0_58 = arith.constant 0 : index
    %133 = vector.load %arg4[%c14, %c0_58] : memref<15x32xf32, #tpu.memory_space<vmem>>, vector<1x32xf32>
    %cst_59 = arith.constant dense<0.000000e+00> : vector<8xf32>
    %134 = vector.multi_reduction <add>, %131, %cst_59 [1] : vector<8x32xf32> to vector<8xf32>
    %135 = vector.shape_cast %134 : vector<8xf32> to vector<8x1xf32>
    %cst_60 = arith.constant 3.200000e+01 : f32
    %136 = vector.broadcast %cst_60 : f32 to vector<8x1xf32>
    %137 = arith.divf %135, %136 : vector<8x1xf32>
    %138 = vector.broadcast %137 : vector<8x1xf32> to vector<8x32xf32>
    %139 = arith.subf %131, %138 : vector<8x32xf32>
    %140 = arith.mulf %139, %139 : vector<8x32xf32>
    %cst_61 = arith.constant dense<0.000000e+00> : vector<8xf32>
    %141 = vector.multi_reduction <add>, %140, %cst_61 [1] : vector<8x32xf32> to vector<8xf32>
    %142 = vector.shape_cast %141 : vector<8xf32> to vector<8x1xf32>
    %cst_62 = arith.constant 3.200000e+01 : f32
    %143 = vector.broadcast %cst_62 : f32 to vector<8x1xf32>
    %144 = arith.divf %142, %143 : vector<8x1xf32>
    %cst_63 = arith.constant 9.99999974E-6 : f32
    %145 = vector.broadcast %cst_63 : f32 to vector<8x1xf32>
    %146 = arith.addf %144, %145 : vector<8x1xf32>
    %147 = math.rsqrt %146 : vector<8x1xf32>
    %148 = vector.broadcast %147 : vector<8x1xf32> to vector<8x32xf32>
    %149 = arith.mulf %139, %148 : vector<8x32xf32>
    %150 = vector.broadcast %132 : vector<1x32xf32> to vector<8x32xf32>
    %151 = arith.mulf %149, %150 : vector<8x32xf32>
    %152 = vector.broadcast %133 : vector<1x32xf32> to vector<8x32xf32>
    %153 = arith.addf %151, %152 : vector<8x32xf32>
    %154 = arith.addf %93, %153 : vector<8x32xf32>
    %cst_64 = arith.constant 0.000000e+00 : f32
    %155 = vector.broadcast %cst_64 : f32 to vector<8x32xf32>
    %156 = arith.maximumf %154, %155 : vector<8x32xf32>
    %c0_65 = arith.constant 0 : index
    %c0_66 = arith.constant 0 : index
    %157 = vector.load %arg5[%c0_65, %c0_66] : memref<32x128xbf16, #tpu.memory_space<vmem>>, vector<32x128xbf16>
    %c0_67 = arith.constant 0 : index
    %c0_68 = arith.constant 0 : index
    %158 = vector.load %arg6[%c0_67, %c0_68] : memref<1x128xf32, #tpu.memory_space<vmem>>, vector<1x128xf32>
    %159 = arith.truncf %156 : vector<8x32xf32> to vector<8x32xbf16>
    %cst_69 = arith.constant dense<0.000000e+00> : vector<8x128xf32>
    %160 = tpu.matmul %159, %157, %cst_69 {dimension_numbers = #tpu.dot_dimension_numbers<[1], [0], [0], [1], [0, 0, 1, 1], [], []>} : vector<8x32xbf16>, vector<32x128xbf16>, vector<8x128xf32> -> vector<8x128xf32>
    %161 = vector.broadcast %158 : vector<1x128xf32> to vector<8x128xf32>
    %162 = arith.addf %160, %161 : vector<8x128xf32>
    %163 = tpu.iota {dimensions = array<i32: 1>} : vector<8x128xi32>
    %c8_i32 = arith.constant 8 : i32
    %164 = vector.broadcast %c8_i32 : i32 to vector<8x128xi32>
    %165 = arith.cmpi sge, %163, %164 : vector<8x128xi32>
    %c16_i32 = arith.constant 16 : i32
    %166 = vector.broadcast %c16_i32 : i32 to vector<8x128xi32>
    %167 = arith.cmpi slt, %163, %166 : vector<8x128xi32>
    %168 = arith.andi %165, %167 : vector<8x128xi1>
    %cst_70 = arith.constant -2.000000e+01 : f32
    %cst_71 = arith.constant 2.000000e+00 : f32
    %169 = vector.broadcast %cst_70 : f32 to vector<8x128xf32>
    %170 = arith.maximumf %169, %162 : vector<8x128xf32>
    %171 = vector.broadcast %cst_71 : f32 to vector<8x128xf32>
    %172 = arith.minimumf %171, %170 : vector<8x128xf32>
    %173 = arith.select %168, %172, %162 : vector<8x128xi1>, vector<8x128xf32>
    %c0_72 = arith.constant 0 : index
    %c0_73 = arith.constant 0 : index
    %174 = vector.load %arg7[%c0_72, %c0_73] : memref<8x128xf32, #tpu.memory_space<vmem>>, vector<8x128xf32>
    tpu.vector_store %arg7[%c0_72, %c0_73], %173 {strides = array<i32>} : memref<8x128xf32, #tpu.memory_space<vmem>>, vector<8x128xf32>,
    return
  }
  func.func @transform_0(%arg0: i32) -> (i32, i32) {
    %c0_i32 = arith.constant 0 : i32
    %c0_i32_0 = arith.constant 0 : i32
    return %arg0, %c0_i32 : i32, i32
  }
  func.func @transform_1(%arg0: i32) -> (i32, i32) {
    %c0_i32 = arith.constant 0 : i32
    %c0_i32_0 = arith.constant 0 : i32
    %c0_i32_1 = arith.constant 0 : i32
    return %c0_i32, %c0_i32_0 : i32, i32
  }
  func.func @transform_2(%arg0: i32) -> (i32, i32, i32) {
    %c0_i32 = arith.constant 0 : i32
    %c0_i32_0 = arith.constant 0 : i32
    %c0_i32_1 = arith.constant 0 : i32
    %c0_i32_2 = arith.constant 0 : i32
    return %c0_i32, %c0_i32_0, %c0_i32_1 : i32, i32, i32
  }
  func.func @transform_3(%arg0: i32) -> (i32, i32) {
    %c0_i32 = arith.constant 0 : i32
    %c0_i32_0 = arith.constant 0 : i32
    %c0_i32_1 = arith.constant 0 : i32
    return %c0_i32, %c0_i32_0 : i32, i32
  }
  func.func @transform_4(%arg0: i32) -> (i32, i32) {
    %c0_i32 = arith.constant 0 : i32
    %c0_i32_0 = arith.constant 0 : i32
    %c0_i32_1 = arith.constant 0 : i32
    return %c0_i32, %c0_i32_0 : i32, i32
  }
  func.func @transform_5(%arg0: i32) -> (i32, i32) {
    %c0_i32 = arith.constant 0 : i32
    %c0_i32_0 = arith.constant 0 : i32
    %c0_i32_1 = arith.constant 0 : i32
    return %c0_i32, %c0_i32_0 : i32, i32
  }
  func.func @transform_6(%arg0: i32) -> (i32, i32) {
    %c0_i32 = arith.constant 0 : i32
    %c0_i32_0 = arith.constant 0 : i32
    return %arg0, %c0_i32 : i32, i32
  }
}

</mosaic_0001>

<bundles_post_ra>
// kernel: tpu_custom_call.1
= control target key start
LH: loop header
LB: loop body
LE: loop exit
PB: predicated region body
PF: predicated region fallthrough
CT: control target
= control target key end

     0   :  { %11 = vsyncpa [#allocation3], 0  ;;  %s1109_s0 = inlined_call_operand.hbm [shape: f32[8,32], index: 0, kind: input, shape index: {}]   ;;  %s1110_s1 = inlined_call_operand.hbm [shape: bf16[32,32], index: 1, kind: input, shape index: {}]   ;;  %s1111_s2 = inlined_call_operand.hbm [shape: bf16[4,32,32], index: 2, kind: input, shape index: {}]   ;;  %s1112_s3 = inlined_call_operand.hbm [shape: f32[15,32], index: 3, kind: input, shape index: {}]   ;;  %s1113_s4 = inlined_call_operand.hbm [shape: bf16[32,128], index: 4, kind: input, shape index: {}]   ;;  %s1114_s5 = inlined_call_operand.vmem [shape: f32[1,128], index: 5, kind: input, shape index: {}]   ;;  %s1115_s6 = inlined_call_operand.hbm [shape: f32[8,128], index: 6, kind: output, shape index: {}]  }
   0x1   :  { %12 = vsyncpa [#allocation6], 0 }
   0x2   :  { %13 = vsyncpa [#allocation9], 0 }
   0x3   :  { %14 = vsyncpa [#allocation4], 0  ;;  %s921_s21 = smov [#allocation5]   ;;  %s781_s25 = scalar_lea.hbm %s1110_s1, 256 }
   0x4   :  { %s30_s22 = sshll.u32 %s921_s21, 4  ;;  %p782_p0 = scmp.ne.s32.totalorder %s1110_s1, %s781_s25  ;;  %s31_s22 = int_to_ptr.vmem [resolvable:$true] %s30_s22 }
   0x5   :  { %p785_p1 = scmp.lt.u32.totalorder %s781_s25, %s1110_s1 }
   0x7   :  { %p787_p2 = pnand %p785_p1, %p782_p0 }
   0x9   :  { %790 = shalt.err (!%p787_p2)
}
   0xa   :  { %s791_s30 = scalar_lea.vmem %s31_s22, 256  ;;  %p796_p4 = scmp.lt.s32.totalorder %s31_s22, %s31_s22 }
   0xb   :  { %p792_p3 = scmp.ne.s32.totalorder %s31_s22, %s791_s30  ;;  %p797_p5 = scmp.lt.s32.totalorder %s791_s30, %s791_s30 }
   0xd   :  { %p798_p6 = por %p797_p5, %p796_p4 }
   0xf   :  { %p799_p7 = pnand %p798_p6, %p792_p3 }
  0x11   :  { %802 = shalt.err (!%p799_p7)
}
  0x12   :  { %s922_s7 = smov 64   ;;  %s923_s8 = smov 4  }
  0x13   :  { %36 = dma.hbm_to_vmem [thread:$0]  %s1110_s1, 256, %s31_s22, [#allocation6], %s922_s7, %s922_s7, %s923_s8  }
  0x14   :  { %s924_s11 = smov [#allocation8]   ;;  %s803_s15 = scalar_lea.hbm %s1112_s3, 256 }
  0x15   :  { %s54_s12 = sshll.u32 %s924_s11, 4  ;;  %p804_p8 = scmp.ne.s32.totalorder %s1112_s3, %s803_s15  ;;  %s55_s12 = int_to_ptr.vmem [resolvable:$true] %s54_s12 }
  0x16   :  { %p807_p9 = scmp.lt.u32.totalorder %s803_s15, %s1112_s3 }
  0x18   :  { %p809_p10 = pnand %p807_p9, %p804_p8 }
  0x1a   :  { %812 = shalt.err (!%p809_p10)
}
  0x1b   :  { %s813_s20 = scalar_lea.vmem %s55_s12, 256  ;;  %p818_p12 = scmp.lt.s32.totalorder %s55_s12, %s55_s12 }
  0x1c   :  { %p814_p11 = scmp.ne.s32.totalorder %s55_s12, %s813_s20  ;;  %p819_p13 = scmp.lt.s32.totalorder %s813_s20, %s813_s20 }
  0x1e   :  { %p820_p0 = por %p819_p13, %p818_p12 }
  0x20   :  { %p821_p1 = pnand %p820_p0, %p814_p11 }
  0x22   :  { %824 = shalt.err (!%p821_p1)
}
  0x23   :  { %s925_s1 = smov 128   ;;  %s926_s21 = smov 8  }
  0x24   :  { %60 = dma.hbm_to_vmem [thread:$0]  %s1112_s3, 256, %s55_s12, [#allocation9], %s925_s1, %s925_s1, %s926_s21  }
  0x25   :  { %s927_s24 = smov [#allocation2]   ;;  %s928_s26 = smov [#allocation7]  }
  0x26   :  { %s21_s25 = sshll.u32 %s927_s24, 4  ;;  %s42_s27 = sshll.u32 %s928_s26, 4  ;;  %s22_s25 = int_to_ptr.vmem [resolvable:$true] %s21_s25  ;;  %s995_s27 = int_to_ptr.vmem [resolvable:$true] %s42_s27 }
  0x27   :  { %s825_s30 = scalar_lea.hbm %s1109_s0, 128 }
  0x28   :  { %p826_p2 = scmp.ne.s32.totalorder %s1109_s0, %s825_s30  ;;  %p829_p3 = scmp.lt.u32.totalorder %s825_s30, %s1109_s0 }
  0x2a   :  { %p831_p4 = pnand %p829_p3, %p826_p2 }
  0x2c   :  { %834 = shalt.err (!%p831_p4)
}
  0x2d   :  { %s835_s3 = scalar_lea.vmem %s22_s25, 128  ;;  %p840_p6 = scmp.lt.s32.totalorder %s22_s25, %s22_s25 }
  0x2e   :  { %p836_p5 = scmp.ne.s32.totalorder %s22_s25, %s835_s3  ;;  %p841_p7 = scmp.lt.s32.totalorder %s835_s3, %s835_s3 }
  0x30   :  { %p842_p8 = por %p841_p7, %p840_p6 }
  0x32   :  { %p843_p9 = pnand %p842_p8, %p836_p5 }
  0x34   :  { %846 = shalt.err (!%p843_p9)
}
  0x35   :  { %24 = dma.hbm_to_vmem [thread:$0]  %s1109_s0, 128, %s22_s25, [#allocation3]  }
  0x36   :  { %s847_s17 = scalar_lea.hbm %s1111_s2, 1024 }
  0x37   :  { %p848_p10 = scmp.ne.s32.totalorder %s1111_s2, %s847_s17  ;;  %p851_p11 = scmp.lt.u32.totalorder %s847_s17, %s1111_s2 }
  0x39   :  { %p853_p12 = pnand %p851_p11, %p848_p10 }
  0x3b   :  { %856 = shalt.err (!%p853_p12)
}
  0x3c   :  { %s857_s21 = scalar_lea.vmem %s995_s27, 1024  ;;  %p862_p0 = scmp.lt.s32.totalorder %s995_s27, %s995_s27 }
  0x3d   :  { %p858_p13 = scmp.ne.s32.totalorder %s995_s27, %s857_s21  ;;  %p863_p1 = scmp.lt.s32.totalorder %s857_s21, %s857_s21 }
  0x3f   :  { %p864_p2 = por %p863_p1, %p862_p0 }
  0x41   :  { %p865_p3 = pnand %p864_p2, %p858_p13 }
  0x43   :  { %868 = shalt.err (!%p865_p3)
}
  0x44   :  { %48 = dma.hbm_to_vmem [thread:$0]  %s1111_s2, 1024, %s995_s27, [#allocation6], %s922_s7, %s922_s7, %s923_s8  }
  0x45   :  { %s929_s23 = smov [#allocation10]   ;;  %s869_s28 = scalar_lea.hbm %s1113_s4, 256 }
  0x46   :  { %s66_s24 = sshll.u32 %s929_s23, 4  ;;  %p870_p4 = scmp.ne.s32.totalorder %s1113_s4, %s869_s28  ;;  %s67_s24 = int_to_ptr.vmem [resolvable:$true] %s66_s24 }
  0x47   :  { %p873_p5 = scmp.lt.u32.totalorder %s869_s28, %s1113_s4 }
  0x49   :  { %p875_p6 = pnand %p873_p5, %p870_p4 }
  0x4b   :  { %878 = shalt.err (!%p875_p6)
}
  0x4c   :  { %s879_s11 = scalar_lea.vmem %s67_s24, 256  ;;  %p884_p8 = scmp.lt.s32.totalorder %s67_s24, %s67_s24 }
  0x4d   :  { %p880_p7 = scmp.ne.s32.totalorder %s67_s24, %s879_s11  ;;  %p885_p9 = scmp.lt.s32.totalorder %s879_s11, %s879_s11 }
  0x4f   :  { %p886_p10 = por %p885_p9, %p884_p8 }
  0x51   :  { %p887_p11 = pnand %p886_p10, %p880_p7 }
  0x53   :  { %890 = shalt.err (!%p887_p11)
}
  0x54   :  { %72 = dma.hbm_to_vmem [thread:$0]  %s1113_s4, 256, %s67_s24, [#allocation9], %s922_s7, %s922_s7, %s923_s8  }
  0x55   :  { %913 = dma.done.wait [#allocation3], 128  }
  0x56   :  { %914 = vsyncadd [#allocation3], 4294967168 }
  0x57   :  { %915 = dma.done.wait [#allocation6], 1280  }
  0x58   :  { %916 = vsyncadd [#allocation6], 4294966016 }
  0x59   :  { %917 = dma.done.wait [#allocation9], 512  }
  0x5a   :  { %918 = vsyncadd [#allocation9], 4294966784  ;;  %v930_v0 = vmov 0.0   ;;  %vm931_vm0 = vmmov 0   ;;  %v759_v1 = vld [vmem:[#allocation5] sm:$0xff]   ;;  %v760_v2 = vld [vmem:[#allocation5 + $0x8] sm:$0xff]  }
  0x5b   :  { %699 = vmatprep.subr.bf16.mxu0 %v930_v0  ;;  %703 = vmatprep.mubr.msk.bf16.mxu0 %vm931_vm0, %v930_v0  ;;  %v91_v3 = vld [vmem:[#allocation2] sm:$0xff]  ;;  %vm114_vm1 = vcmask 261120   ;;  %v647_v5 = vld [vmem:[#allocation8] ss:$0 sm:$0xff]  ;;  %v651_v23 = vld [vmem:[#allocation8 + $0x1] ss:$0 sm:$0xff] }
  0x5c   :  { %707 = vmatprep.subr.bf16.mxu1 %v930_v0  ;;  %711 = vmatprep.mubr.msk.bf16.mxu1 %vm931_vm0, %v930_v0  ;;  %v97_v4 = vpack.c.bf16 %v91_v3, %v91_v3  ;;  %v761_v17 = vld [vmem:[#allocation7] sm:$0xff]   ;;  %v762_v18 = vld [vmem:[#allocation7 + $0x8] sm:$0xff]   ;;  %v763_v42 = vld [vmem:[#allocation7 + $0x10] sm:$0xff]   ;;  %s932_s8 = smov [#allocation11]  }
  0x5d   :  { %700 = vmatpush3.bf16.msra.mxu0 %v759_v1  ;;  %708 = vmatpush3.bf16.msra.mxu1 %v761_v17  ;;  %v652_v25 = vld [vmem:[#allocation8 + $0x2] ss:$0 sm:$0xff]  ;;  %v653_v30 = vld [vmem:[#allocation8 + $0x3] ss:$0 sm:$0xff]  ;;  %v764_v43 = vld [vmem:[#allocation7 + $0x18] sm:$0xff]   ;;  %s636_s13 = sshll.u32 %s932_s8, 4  ;;  %s637_s13 = int_to_ptr.vmem [resolvable:$true] %s636_s13 }
  0x5e   :  { %701 = vmatprep.subr.bf16.mxu0 %v930_v0  ;;  %709 = vmatprep.subr.bf16.mxu1 %v930_v0  ;;  %v657_v48 = vld [vmem:[#allocation8 + $0x4] ss:$0 sm:$0xff]  ;;  %v658_v50 = vld [vmem:[#allocation8 + $0x5] ss:$0 sm:$0xff]  ;;  %v659_v55 = vld [vmem:[#allocation8 + $0x6] ss:$0 sm:$0xff]  ;;  %p896_p13 = scmp.lt.s32.totalorder %s637_s13, %s637_s13 }
  0x5f   :  { %s891_s3 = scalar_lea.vmem %s637_s13, 128 }
  0x60   :  { %p892_p12 = scmp.ne.s32.totalorder %s637_s13, %s891_s3  ;;  %p897_p0 = scmp.lt.s32.totalorder %s891_s3, %s891_s3 }
  0x61   :  { %702 = vmatpush3.bf16.msra.mxu0 %v760_v2  ;;  %710 = vmatpush3.bf16.msra.mxu1 %v762_v18  ;;  %v665_v18 = vld [vmem:[#allocation8 + $0x9] ss:$0 sm:$0xff] }
  0x62   :  { %715 = vmatprep.subr.bf16.mxu0 %v930_v0  ;;  %723 = vmatprep.subr.bf16.mxu1 %v930_v0  ;;  %p898_p1 = por %p897_p0, %p896_p13 }
  0x64   :  { %704 = vmatmul.mubr.msk.bf16.vlgmr.msra.gmra.mrb[0].mxu0 %vm114_vm1, %v97_v4  ;;  %v765_v4 = vld [vmem:[#allocation7 + $0x20] sm:$0xff]   ;;  %p899_p2 = pnand %p898_p1, %p892_p12 }
  0x65   :  { %719 = vmatprep.mubr.msk.bf16.mxu0 %vm931_vm0, %v930_v0  ;;  %716 = vmatpush3.bf16.msra.mxu0 %v763_v42 }
  0x66   :  { %717 = vmatprep.subr.bf16.mxu0 %v930_v0 }
  0x69   :  { %718 = vmatpush3.bf16.msra.mxu0 %v764_v43  ;;  %v671_v43 = vld [vmem:[#allocation8 + $0xc] ss:$0 sm:$0xff] }
  0x6a   :  { %731 = vmatprep.subr.bf16.mxu0 %v930_v0 }
 0x137   :  { %v152_v6 = vpop.f32.mrb[0].mxu0 }
 0x138   :  { %v153_v7 = vadd.f32 %v647_v5, %v152_v6  ;;  %v705_v8 = vpop.f32.mrb[1].mxu0  ;;  %v766_v5 = vld [vmem:[#allocation7 + $0x28] sm:$0xff]  }
 0x139   :  { %v155_v9 = vpop.f32.mrb[2].mxu0 }
 0x13a   :  { %v706_v10 = vpop.f32.mrb[3].mxu0  ;;  %v160_v11 = vsel %vm114_vm1, %v153_v7, 0.0 }
 0x13b   :  { %161 = vadd.xlane.f32.xlu0 %v160_v11  ;;  %v663_v10 = vld [vmem:[#allocation8 + $0x7] ss:$0 sm:$0xff] }
 0x1c8   :  { %v162_v12 = vpop.xlane.xlu0 %161 }
 0x1c9   :  { %v164_v13 = vmul.f32 0.03125, %v162_v12  ;;  %v664_v12 = vld [vmem:[#allocation8 + $0x8] ss:$0 sm:$0xff] }
 0x1cb   :  { %v165_v14 = vsub.f32 %v153_v7, %v164_v13 }
 0x1cd   :  { %v166_v15 = vmul.f32 %v165_v14, %v165_v14 }
 0x1cf   :  { %v167_v16 = vsel %vm114_vm1, %v166_v15, 0.0 }
 0x1d0   :  { %168 = vadd.xlane.f32.xlu0 %v167_v16 }
 0x25d   :  { %v169_v19 = vpop.xlane.xlu0 %168 }
 0x25e   :  { %v170_v20 = vmul.f32 0.03125, %v169_v19 }
 0x260   :  { %v171_v21 = vadd.f32 1e-05, %v170_v20 }
 0x262   :  { %771 = vrsqrt.f32 %v171_v21 }
 0x26c   :  { %v772_v22 = vpop.eup %771 }
 0x26d   :  { %v173_v24 = vmul.f32 %v772_v22, %v165_v14 }
 0x26f   :  { %v178_v26 = vmul.f32 %v651_v23, %v173_v24 }
 0x271   :  { %v183_v27 = vadd.f32 %v652_v25, %v178_v26 }
 0x273   :  { %v1059_v28 = vmax.f32 %v183_v27, 0.0 }
 0x275   :  { %v190_v29 = vpack.c.bf16 %v1059_v28, %v1059_v28 }
 0x277   :  { %712 = vmatmul.mubr.msk.bf16.vlgmr.msra.gmra.mrb[0].mxu1 %vm114_vm1, %v190_v29 }
 0x278   :  { %727 = vmatprep.mubr.msk.bf16.mxu1 %vm931_vm0, %v930_v0  ;;  %724 = vmatpush3.bf16.msra.mxu1 %v765_v4 }
 0x279   :  { %725 = vmatprep.subr.bf16.mxu1 %v930_v0 }
 0x27c   :  { %726 = vmatpush3.bf16.msra.mxu1 %v766_v5 }
 0x27d   :  { %739 = vmatprep.subr.bf16.mxu1 %v930_v0 }
 0x34a   :  { %v244_v31 = vpop.f32.mrb[0].mxu1 }
 0x34b   :  { %v245_v32 = vadd.f32 %v653_v30, %v244_v31  ;;  %v713_v33 = vpop.f32.mrb[1].mxu1  ;;  %v767_v30 = vld [vmem:[#allocation7 + $0x30] sm:$0xff]   ;;  %v768_v31 = vld [vmem:[#allocation7 + $0x38] sm:$0xff]  }
 0x34c   :  { %v247_v34 = vpop.f32.mrb[2].mxu1 }
 0x34d   :  { %v714_v35 = vpop.f32.mrb[3].mxu1  ;;  %v252_v36 = vsel %vm114_vm1, %v245_v32, 0.0 }
 0x34e   :  { %253 = vadd.xlane.f32.xlu1 %v252_v36  ;;  %v669_v36 = vld [vmem:[#allocation8 + $0xa] ss:$0 sm:$0xff] }
 0x3db   :  { %v254_v37 = vpop.xlane.xlu1 %253 }
 0x3dc   :  { %v255_v38 = vmul.f32 0.03125, %v254_v37 }
 0x3de   :  { %v256_v39 = vsub.f32 %v245_v32, %v255_v38  ;;  %v670_v38 = vld [vmem:[#allocation8 + $0xb] ss:$0 sm:$0xff] }
 0x3e0   :  { %v257_v40 = vmul.f32 %v256_v39, %v256_v39 }
 0x3e2   :  { %v258_v41 = vsel %vm114_vm1, %v257_v40, 0.0 }
 0x3e3   :  { %259 = vadd.xlane.f32.xlu1 %v258_v41 }
 0x470   :  { %v260_v44 = vpop.xlane.xlu1 %259 }
 0x471   :  { %v261_v45 = vmul.f32 0.03125, %v260_v44 }
 0x473   :  { %v262_v46 = vadd.f32 1e-05, %v261_v45 }
 0x475   :  { %773 = vrsqrt.f32 %v262_v46 }
 0x47f   :  { %v774_v47 = vpop.eup %773 }
 0x480   :  { %v264_v49 = vmul.f32 %v774_v47, %v256_v39 }
 0x482   :  { %v269_v51 = vmul.f32 %v657_v48, %v264_v49 }
 0x484   :  { %v274_v52 = vadd.f32 %v658_v50, %v269_v51 }
 0x486   :  { %v275_v53 = vmax.f32 %v274_v52, 0.0 }
 0x488   :  { %v282_v54 = vpack.c.bf16 %v275_v53, %v275_v53 }
 0x48a   :  { %720 = vmatmul.mubr.msk.bf16.vlgmr.msra.gmra.mrb[4].mxu0 %vm114_vm1, %v282_v54 }
 0x48b   :  { %735 = vmatprep.mubr.msk.bf16.mxu0 %vm931_vm0, %v930_v0  ;;  %732 = vmatpush3.bf16.msra.mxu0 %v767_v30 }
 0x48c   :  { %733 = vmatprep.subr.bf16.mxu0 %v930_v0 }
 0x48f   :  { %734 = vmatpush3.bf16.msra.mxu0 %v768_v31 }
 0x55d   :  { %v336_v56 = vpop.f32.mrb[4].mxu0 }
 0x55e   :  { %v337_v57 = vadd.f32 %v659_v55, %v336_v56  ;;  %v721_v58 = vpop.f32.mrb[5].mxu0  ;;  %v769_v55 = vld [vmem:[#allocation10] sm:$0xff]   ;;  %v770_v56 = vld [vmem:[#allocation10 + $0x8] sm:$0xff]  }
 0x55f   :  { %v339_v59 = vpop.f32.mrb[6].mxu0 }
 0x560   :  { %v722_v60 = vpop.f32.mrb[7].mxu0  ;;  %v344_v61 = vsel %vm114_vm1, %v337_v57, 0.0 }
 0x561   :  { %345 = vadd.xlane.f32.xlu0 %v344_v61  ;;  %v675_v61 = vld [vmem:[#allocation8 + $0xd] ss:$0 sm:$0xff] }
 0x5ee   :  { %v346_v62 = vpop.xlane.xlu0 %345 }
 0x5ef   :  { %v347_v63 = vmul.f32 0.03125, %v346_v62 }
 0x5f1   :  { %v348_v1 = vsub.f32 %v337_v57, %v347_v63  ;;  %v676_v63 = vld [vmem:[#allocation8 + $0xe] ss:$0 sm:$0xff] }
 0x5f3   :  { %v349_v2 = vmul.f32 %v348_v1, %v348_v1 }
 0x5f5   :  { %v350_v3 = vsel %vm114_vm1, %v349_v2, 0.0 }
 0x5f6   :  { %351 = vadd.xlane.f32.xlu1 %v350_v3 }
 0x683   :  { %v352_v6 = vpop.xlane.xlu1 %351 }
 0x684   :  { %v353_v7 = vmul.f32 0.03125, %v352_v6  ;;  %v621_v6 = vlaneseq }
 0x686   :  { %v354_v8 = vadd.f32 1e-05, %v353_v7  ;;  %v622_v7 = vand.u32 127, %v621_v6 }
 0x688   :  { %775 = vrsqrt.f32 %v354_v8  ;;  %vm623_vm2 = vcmp.ge.s32.totalorder %v622_v7, 8  ;;  %vm624_vm3 = vcmp.lt.s32.totalorder %v622_v7, 16 }
 0x689   :  { %vm625_vm4 = vmand %vm623_vm2, %vm624_vm3 }
 0x692   :  { %v776_v9 = vpop.eup %775 }
 0x693   :  { %v356_v11 = vmul.f32 %v776_v9, %v348_v1 }
 0x695   :  { %v361_v13 = vmul.f32 %v663_v10, %v356_v11 }
 0x697   :  { %v366_v14 = vadd.f32 %v664_v12, %v361_v13 }
 0x699   :  { %v367_v15 = vadd.f32 %v366_v14, %v1059_v28 }
 0x69b   :  { %v1078_v16 = vmax.f32 %v367_v15, 0.0 }
 0x69d   :  { %v375_v17 = vpack.c.bf16 %v1078_v16, %v1078_v16 }
 0x69f   :  { %728 = vmatmul.mubr.msk.bf16.vlgmr.msra.gmra.mrb[4].mxu1 %vm114_vm1, %v375_v17 }
 0x6a0   :  { %743 = vmatprep.mubr.msk.bf16.mxu1 %vm931_vm0, %v930_v0  ;;  %740 = vmatpush3.bf16.msra.mxu1 %v769_v55 }
 0x6a1   :  { %741 = vmatprep.subr.bf16.mxu1 %v930_v0  ;;  %v677_v0 = vld [vmem:[%s1114_s5] ss:$0 sm:$0xff] }
 0x6a4   :  { %742 = vmatpush3.bf16.msra.mxu1 %v770_v56 }
 0x772   :  { %v429_v19 = vpop.f32.mrb[4].mxu1 }
 0x773   :  { %v430_v20 = vadd.f32 %v665_v18, %v429_v19  ;;  %v729_v21 = vpop.f32.mrb[5].mxu1 }
 0x774   :  { %v432_v22 = vpop.f32.mrb[6].mxu1 }
 0x775   :  { %v730_v23 = vpop.f32.mrb[7].mxu1  ;;  %v437_v24 = vsel %vm114_vm1, %v430_v20, 0.0 }
 0x776   :  { %438 = vadd.xlane.f32.xlu0 %v437_v24 }
 0x803   :  { %v439_v25 = vpop.xlane.xlu0 %438 }
 0x804   :  { %v440_v26 = vmul.f32 0.03125, %v439_v25 }
 0x806   :  { %v441_v27 = vsub.f32 %v430_v20, %v440_v26 }
 0x808   :  { %v442_v28 = vmul.f32 %v441_v27, %v441_v27 }
 0x80a   :  { %v443_v29 = vsel %vm114_vm1, %v442_v28, 0.0 }
 0x80b   :  { %444 = vadd.xlane.f32.xlu1 %v443_v29 }
 0x898   :  { %v445_v32 = vpop.xlane.xlu1 %444 }
 0x899   :  { %v446_v33 = vmul.f32 0.03125, %v445_v32 }
 0x89b   :  { %v447_v34 = vadd.f32 1e-05, %v446_v33 }
 0x89d   :  { %777 = vrsqrt.f32 %v447_v34 }
 0x8a7   :  { %v778_v35 = vpop.eup %777 }
 0x8a8   :  { %v449_v37 = vmul.f32 %v778_v35, %v441_v27 }
 0x8aa   :  { %v454_v39 = vmul.f32 %v669_v36, %v449_v37 }
 0x8ac   :  { %v459_v40 = vadd.f32 %v670_v38, %v454_v39 }
 0x8ae   :  { %v460_v41 = vmax.f32 %v459_v40, 0.0 }
 0x8b0   :  { %v467_v42 = vpack.c.bf16 %v460_v41, %v460_v41 }
 0x8b2   :  { %736 = vmatmul.mubr.msk.bf16.vlgmr.msra.gmra.mrb[8].mxu0 %vm114_vm1, %v467_v42 }
 0x985   :  { %v521_v44 = vpop.f32.mrb[8].mxu0 }
 0x986   :  { %v522_v45 = vadd.f32 %v671_v43, %v521_v44  ;;  %v737_v46 = vpop.f32.mrb[9].mxu0 }
 0x987   :  { %v524_v47 = vpop.f32.mrb[10].mxu0 }
 0x988   :  { %v738_v48 = vpop.f32.mrb[11].mxu0  ;;  %v529_v49 = vsel %vm114_vm1, %v522_v45, 0.0 }
 0x989   :  { %530 = vadd.xlane.f32.xlu0 %v529_v49 }
 0xa16   :  { %v531_v50 = vpop.xlane.xlu0 %530 }
 0xa17   :  { %v532_v51 = vmul.f32 0.03125, %v531_v50 }
 0xa19   :  { %v533_v52 = vsub.f32 %v522_v45, %v532_v51 }
 0xa1b   :  { %v534_v53 = vmul.f32 %v533_v52, %v533_v52 }
 0xa1d   :  { %v535_v54 = vsel %vm114_vm1, %v534_v53, 0.0 }
 0xa1e   :  { %536 = vadd.xlane.f32.xlu1 %v535_v54 }
 0xaab   :  { %v537_v57 = vpop.xlane.xlu1 %536 }
 0xaac   :  { %v538_v58 = vmul.f32 0.03125, %v537_v57 }
 0xaae   :  { %v539_v59 = vadd.f32 1e-05, %v538_v58 }
 0xab0   :  { %779 = vrsqrt.f32 %v539_v59 }
 0xaba   :  { %v780_v60 = vpop.eup %779 }
 0xabb   :  { %v541_v62 = vmul.f32 %v780_v60, %v533_v52 }
 0xabd   :  { %v546_v1 = vmul.f32 %v675_v61, %v541_v62 }
 0xabf   :  { %v551_v2 = vadd.f32 %v676_v63, %v546_v1 }
 0xac1   :  { %v552_v3 = vadd.f32 %v551_v2, %v1078_v16 }
 0xac3   :  { %v553_v4 = vmax.f32 %v552_v3, 0.0 }
 0xac5   :  { %v559_v5 = vpack.c.bf16 %v553_v4, %v553_v4 }
 0xac7   :  { %744 = vmatmul.mubr.msk.bf16.vlgmr.msra.gmra.mrb[8].mxu1 %vm114_vm1, %v559_v5 }
 0xb9a   :  { %v615_v8 = vpop.f32.mrb[8].mxu1 }
 0xb9b   :  { %v616_v9 = vadd.f32 %v677_v0, %v615_v8  ;;  %v745_v10 = vpop.f32.mrb[9].mxu1 }
 0xb9c   :  { %v618_v11 = vpop.f32.mrb[10].mxu1 }
 0xb9d   :  { %v626_v12 = vmax.f32 %v616_v9, -20.0  ;;  %v746_v13 = vpop.f32.mrb[11].mxu1 }
 0xb9f   :  { %v627_v14 = vmin.f32 %v626_v12, 2.0 }
 0xba1   :  { %v628_v15 = vsel %vm625_vm4, %v627_v14, %v616_v9 }
 0xba2   :  { %629 = vst [vmem:[#allocation11] sm:$0xff] %v628_v15 }
 0xba3   :  { %902 = shalt.err (!%p899_p2)
}
 0xba4   :  { %s903_s14 = scalar_lea.hbm %s1115_s6, 128 }
 0xba5   :  { %p904_p3 = scmp.ne.s32.totalorder %s1115_s6, %s903_s14  ;;  %p907_p4 = scmp.lt.u32.totalorder %s903_s14, %s1115_s6 }
 0xba7   :  { %p909_p5 = pnand %p907_p4, %p904_p3 }
 0xba9   :  { %912 = shalt.err (!%p909_p5)
}
 0xbaa   :  { %639 = dma.vmem_to_hbm [thread:$0]  %s637_s13, 128, %s1115_s6, [#allocation4]  }
 0xbab   :  { %919 = dma.done.wait [#allocation4], 128  }
 0xbac   :  { %920 = vsyncadd [#allocation4], 4294967168 }
 0xbad   :  { %643 = vsyncpa [#allocation3], 1 }
 0xbae   :  { %644 = vsyncpa [#allocation6], 1 }
 0xbaf   :  { %645 = vsyncpa [#allocation9], 1 }
 0xbb0   :  { %646 = vsyncpa [#allocation4], 1 }

</bundles_post_ra>
